<compile_context>
chip_gen: v7x
topology: tpu7x:2x2x1
jax: 0.10.0
libtpu: 0.0.40
codegen_flags: <defaults>
</compile_context>

<pallas_src>
import jax
import jax.numpy as jnp
from jax.experimental import pallas as pl
from jax.experimental.pallas import tpu as pltpu


def _leaky_relu(x, slope=0.01):
    # mul + max: cheaper on the VALU than compare+select, no predicate vreg.
    return jnp.maximum(x, slope * x)


def _batchnorm_train_folded(h, gamma, beta, eps=1e-5):
    """Training-mode BatchNorm1d folded to a single scale/shift.

    Stats are computed over the batch axis with the biased (1/N) variance,
    exactly like torch.nn.BatchNorm1d in train mode.  scale/shift live on a
    [1, N] row, so the per-element cost is just fma-style mul+add.
    """
    mean = jnp.mean(h, axis=0, keepdims=True)            # [1, N]
    mean_sq = jnp.mean(h * h, axis=0, keepdims=True)      # [1, N]
    var = mean_sq - mean * mean                            # biased variance
    scale = gamma * jax.lax.rsqrt(var + eps)               # [1, N] (EUP rsqrt)
    shift = beta - mean * scale                            # [1, N]
    return h * scale + shift


def actor_kernel(x_ref,
                 w1_ref, b1_ref, g1_ref, be1_ref,
                 w2_ref, b2_ref, g2_ref, be2_ref,
                 w3_ref, b3_ref,
                 o_ref):
    x = x_ref[...]

    # fc1 + BN1 + leaky_relu
    h = jnp.dot(x, w1_ref[...], preferred_element_type=jnp.float32) + b1_ref[...]
    h = _batchnorm_train_folded(h, g1_ref[...], be1_ref[...])
    h = _leaky_relu(h)

    # fc2 + BN2 + leaky_relu
    h = jnp.dot(h, w2_ref[...], preferred_element_type=jnp.float32) + b2_ref[...]
    h = _batchnorm_train_folded(h, g2_ref[...], be2_ref[...])
    h = _leaky_relu(h)

    # fc3 + tanh
    y = jnp.dot(h, w3_ref[...], preferred_element_type=jnp.float32) + b3_ref[...]
    o_ref[...] = jnp.tanh(y).astype(o_ref.dtype)


def actor_forward(x, params):
    """x: [B, state_size] float32.  params: dict of weights (see init_actor_params).

    Note: for B == 1 this computes BN with zero batch variance (output = beta per
    feature before the activation); PyTorch BatchNorm1d raises an error for B == 1
    in train mode, so single-row inference is not a supported training-mode path.
    """
    if x.ndim == 1:
        x = x[None, :]
    x = x.astype(jnp.float32)
    B, state_size = x.shape
    fc1_units = params["w1"].shape[1]
    fc2_units = params["w2"].shape[1]
    action_size = params["w3"].shape[1]

    args = (
        x,
        params["w1"], params["b1"], params["g1"], params["be1"],
        params["w2"], params["b2"], params["g2"], params["be2"],
        params["w3"], params["b3"],
    )
    vmem_spec = pl.BlockSpec(memory_space=pltpu.MemorySpace.VMEM)

    # Rough VMEM budget so large batches amortized into one call don't trip the
    # default scoped-VMEM limit; clamped to stay safe on v7x (64 MiB physical).
    weight_elems = sum(int(params[k].size) for k in
                       ("w1", "b1", "g1", "be1", "w2", "b2", "g2", "be2", "w3", "b3"))
    act_elems = B * (state_size + fc1_units + fc2_units + action_size)
    vmem_bytes = 4 * (act_elems + weight_elems) * 2 + (4 << 20)
    vmem_bytes = int(min(max(vmem_bytes, 16 << 20), 48 << 20))

    return pl.pallas_call(
        actor_kernel,
        out_shape=jax.ShapeDtypeStruct((B, action_size), jnp.float32),
        in_specs=[vmem_spec] * len(args),
        out_specs=vmem_spec,
        compiler_params=pltpu.CompilerParams(vmem_limit_bytes=vmem_bytes),
    )(*args)


def init_actor_params(key, state_size, action_size, fc1_units=256, fc2_units=128):
    """Deterministic init mirroring Actor.reset_parameters().

    fc1/fc2 weights ~ U(-1/sqrt(out_features), +1/sqrt(out_features))  (hidden_init
    uses weight.size()[0] == out_features), fc3 weight ~ U(-3e-3, 3e-3).
    Biases keep the default nn.Linear init U(-1/sqrt(in_features), +1/sqrt(in_features)).
    Weights are stored transposed: [in, out] so the kernel computes x @ W + b.
    """
    ks = jax.random.split(key, 6)

    def u(k, shape, lim):
        return jax.random.uniform(k, shape, jnp.float32, -lim, lim)

    lim1 = 1.0 / jnp.sqrt(jnp.float32(fc1_units))
    lim2 = 1.0 / jnp.sqrt(jnp.float32(fc2_units))
    params = {
        "w1": u(ks[0], (state_size, fc1_units), lim1),
        "b1": u(ks[1], (1, fc1_units), 1.0 / jnp.sqrt(jnp.float32(state_size))),
        "g1": jnp.ones((1, fc1_units), jnp.float32),
        "be1": jnp.zeros((1, fc1_units), jnp.float32),
        "w2": u(ks[2], (fc1_units, fc2_units), lim2),
        "b2": u(ks[3], (1, fc2_units), 1.0 / jnp.sqrt(jnp.float32(fc1_units))),
        "g2": jnp.ones((1, fc2_units), jnp.float32),
        "be2": jnp.zeros((1, fc2_units), jnp.float32),
        "w3": u(ks[4], (fc2_units, action_size), 0.003),
        "b3": u(ks[5], (1, action_size), 1.0 / jnp.sqrt(jnp.float32(fc2_units))),
    }
    return params


def actor_ref(x, params):
    """Pure-JAX reference (two-pass BN, where-based leaky_relu) for correctness."""
    if x.ndim == 1:
        x = x[None, :]

    def bn(h, g, b, eps=1e-5):
        mean = jnp.mean(h, axis=0, keepdims=True)
        var = jnp.mean((h - mean) ** 2, axis=0, keepdims=True)
        return (h - mean) * jax.lax.rsqrt(var + eps) * g + b

    def lrelu(h, slope=0.01):
        return jnp.where(h >= 0, h, slope * h)

    h = x @ params["w1"] + params["b1"]
    h = lrelu(bn(h, params["g1"], params["be1"]))
    h = h @ params["w2"] + params["b2"]
    h = lrelu(bn(h, params["g2"], params["be2"]))
    return jnp.tanh(h @ params["w3"] + params["b3"])


if __name__ == "__main__":
    key = jax.random.PRNGKey(0)
    k_param, k_x = jax.random.split(key)

    batch = 8
    state_size = 32
    action_size = 4

    params = init_actor_params(k_param, state_size, action_size)
    x = jax.random.normal(k_x, (batch, state_size), jnp.float32)

    out = actor_forward(x, params)
    out = jax.block_until_ready(out)

    ref = actor_ref(x, params)
    assert out.shape == (batch, action_size), out.shape
    assert jnp.allclose(out, ref, atol=2e-5, rtol=2e-5), "mismatch vs reference"

    print("KERNEL_OK")
</pallas_src>

<mosaic_0001>
module attributes {stable_mosaic.version = 11 : i64} {
  func.func @actor_kernel(%arg0: memref<8x32xf32, #tpu.memory_space<vmem>>, %arg1: memref<32x256xf32, #tpu.memory_space<vmem>>, %arg2: memref<1x256xf32, #tpu.memory_space<vmem>>, %arg3: memref<1x256xf32, #tpu.memory_space<vmem>>, %arg4: memref<1x256xf32, #tpu.memory_space<vmem>>, %arg5: memref<256x128xf32, #tpu.memory_space<vmem>>, %arg6: memref<1x128xf32, #tpu.memory_space<vmem>>, %arg7: memref<1x128xf32, #tpu.memory_space<vmem>>, %arg8: memref<1x128xf32, #tpu.memory_space<vmem>>, %arg9: memref<128x4xf32, #tpu.memory_space<vmem>>, %arg10: memref<1x4xf32, #tpu.memory_space<vmem>>, %arg11: memref<8x4xf32, #tpu.memory_space<vmem>>) attributes {dimension_semantics = [], scalar_prefetch = 0 : i64, scratch_operands = 0 : i64, tpu.core_type = #tpu.core_type<tc>} {
    %c0 = arith.constant 0 : index
    %c0_0 = arith.constant 0 : index
    %0 = vector.load %arg0[%c0, %c0_0] : memref<8x32xf32, #tpu.memory_space<vmem>>, vector<8x32xf32>
    %c0_1 = arith.constant 0 : index
    %c0_2 = arith.constant 0 : index
    %1 = vector.load %arg1[%c0_1, %c0_2] : memref<32x256xf32, #tpu.memory_space<vmem>>, vector<32x256xf32>
    %cst = arith.constant dense<0.000000e+00> : vector<8x256xf32>
    %2 = tpu.matmul %0, %1, %cst {dimension_numbers = #tpu.dot_dimension_numbers<[1], [0], [0], [1], [0, 0, 1, 1], [], []>} : vector<8x32xf32>, vector<32x256xf32>, vector<8x256xf32> -> vector<8x256xf32>
    %c0_3 = arith.constant 0 : index
    %c0_4 = arith.constant 0 : index
    %3 = vector.load %arg2[%c0_3, %c0_4] : memref<1x256xf32, #tpu.memory_space<vmem>>, vector<1x256xf32>
    %4 = vector.broadcast %3 : vector<1x256xf32> to vector<8x256xf32>
    %5 = arith.addf %2, %4 : vector<8x256xf32>
    %c0_5 = arith.constant 0 : index
    %c0_6 = arith.constant 0 : index
    %6 = vector.load %arg3[%c0_5, %c0_6] : memref<1x256xf32, #tpu.memory_space<vmem>>, vector<1x256xf32>
    %c0_7 = arith.constant 0 : index
    %c0_8 = arith.constant 0 : index
    %7 = vector.load %arg4[%c0_7, %c0_8] : memref<1x256xf32, #tpu.memory_space<vmem>>, vector<1x256xf32>
    %cst_9 = arith.constant dense<0.000000e+00> : vector<256xf32>
    %8 = vector.multi_reduction <add>, %5, %cst_9 [0] : vector<8x256xf32> to vector<256xf32>
    %9 = vector.shape_cast %8 : vector<256xf32> to vector<1x256xf32>
    %cst_10 = arith.constant 8.000000e+00 : f32
    %10 = vector.broadcast %cst_10 : f32 to vector<1x256xf32>
    %11 = arith.divf %9, %10 : vector<1x256xf32>
    %12 = arith.mulf %5, %5 : vector<8x256xf32>
    %cst_11 = arith.constant dense<0.000000e+00> : vector<256xf32>
    %13 = vector.multi_reduction <add>, %12, %cst_11 [0] : vector<8x256xf32> to vector<256xf32>
    %14 = vector.shape_cast %13 : vector<256xf32> to vector<1x256xf32>
    %cst_12 = arith.constant 8.000000e+00 : f32
    %15 = vector.broadcast %cst_12 : f32 to vector<1x256xf32>
    %16 = arith.divf %14, %15 : vector<1x256xf32>
    %17 = arith.mulf %11, %11 : vector<1x256xf32>
    %18 = arith.subf %16, %17 : vector<1x256xf32>
    %cst_13 = arith.constant 9.99999974E-6 : f32
    %19 = vector.broadcast %cst_13 : f32 to vector<1x256xf32>
    %20 = arith.addf %18, %19 : vector<1x256xf32>
    %21 = math.rsqrt %20 : vector<1x256xf32>
    %22 = arith.mulf %6, %21 : vector<1x256xf32>
    %23 = arith.mulf %11, %22 : vector<1x256xf32>
    %24 = arith.subf %7, %23 : vector<1x256xf32>
    %25 = vector.broadcast %22 : vector<1x256xf32> to vector<8x256xf32>
    %26 = arith.mulf %5, %25 : vector<8x256xf32>
    %27 = vector.broadcast %24 : vector<1x256xf32> to vector<8x256xf32>
    %28 = arith.addf %26, %27 : vector<8x256xf32>
    %cst_14 = arith.constant 0.00999999977 : f32
    %29 = vector.broadcast %cst_14 : f32 to vector<8x256xf32>
    %30 = arith.mulf %29, %28 : vector<8x256xf32>
    %31 = arith.maximumf %28, %30 : vector<8x256xf32>
    %c0_15 = arith.constant 0 : index
    %c0_16 = arith.constant 0 : index
    %32 = vector.load %arg5[%c0_15, %c0_16] : memref<256x128xf32, #tpu.memory_space<vmem>>, vector<256x128xf32>
    %cst_17 = arith.constant dense<0.000000e+00> : vector<8x128xf32>
    %33 = tpu.matmul %31, %32, %cst_17 {dimension_numbers = #tpu.dot_dimension_numbers<[1], [0], [0], [1], [0, 0, 1, 1], [], []>} : vector<8x256xf32>, vector<256x128xf32>, vector<8x128xf32> -> vector<8x128xf32>
    %c0_18 = arith.constant 0 : index
    %c0_19 = arith.constant 0 : index
    %34 = vector.load %arg6[%c0_18, %c0_19] : memref<1x128xf32, #tpu.memory_space<vmem>>, vector<1x128xf32>
    %35 = vector.broadcast %34 : vector<1x128xf32> to vector<8x128xf32>
    %36 = arith.addf %33, %35 : vector<8x128xf32>
    %c0_20 = arith.constant 0 : index
    %c0_21 = arith.constant 0 : index
    %37 = vector.load %arg7[%c0_20, %c0_21] : memref<1x128xf32, #tpu.memory_space<vmem>>, vector<1x128xf32>
    %c0_22 = arith.constant 0 : index
    %c0_23 = arith.constant 0 : index
    %38 = vector.load %arg8[%c0_22, %c0_23] : memref<1x128xf32, #tpu.memory_space<vmem>>, vector<1x128xf32>
    %cst_24 = arith.constant dense<0.000000e+00> : vector<128xf32>
    %39 = vector.multi_reduction <add>, %36, %cst_24 [0] : vector<8x128xf32> to vector<128xf32>
    %40 = vector.shape_cast %39 : vector<128xf32> to vector<1x128xf32>
    %cst_25 = arith.constant 8.000000e+00 : f32
    %41 = vector.broadcast %cst_25 : f32 to vector<1x128xf32>
    %42 = arith.divf %40, %41 : vector<1x128xf32>
    %43 = arith.mulf %36, %36 : vector<8x128xf32>
    %cst_26 = arith.constant dense<0.000000e+00> : vector<128xf32>
    %44 = vector.multi_reduction <add>, %43, %cst_26 [0] : vector<8x128xf32> to vector<128xf32>
    %45 = vector.shape_cast %44 : vector<128xf32> to vector<1x128xf32>
    %cst_27 = arith.constant 8.000000e+00 : f32
    %46 = vector.broadcast %cst_27 : f32 to vector<1x128xf32>
    %47 = arith.divf %45, %46 : vector<1x128xf32>
    %48 = arith.mulf %42, %42 : vector<1x128xf32>
    %49 = arith.subf %47, %48 : vector<1x128xf32>
    %cst_28 = arith.constant 9.99999974E-6 : f32
    %50 = vector.broadcast %cst_28 : f32 to vector<1x128xf32>
    %51 = arith.addf %49, %50 : vector<1x128xf32>
    %52 = math.rsqrt %51 : vector<1x128xf32>
    %53 = arith.mulf %37, %52 : vector<1x128xf32>
    %54 = arith.mulf %42, %53 : vector<1x128xf32>
    %55 = arith.subf %38, %54 : vector<1x128xf32>
    %56 = vector.broadcast %53 : vector<1x128xf32> to vector<8x128xf32>
    %57 = arith.mulf %36, %56 : vector<8x128xf32>
    %58 = vector.broadcast %55 : vector<1x128xf32> to vector<8x128xf32>
    %59 = arith.addf %57, %58 : vector<8x128xf32>
    %cst_29 = arith.constant 0.00999999977 : f32
    %60 = vector.broadcast %cst_29 : f32 to vector<8x128xf32>
    %61 = arith.mulf %60, %59 : vector<8x128xf32>
    %62 = arith.maximumf %59, %61 : vector<8x128xf32>
    %c0_30 = arith.constant 0 : index
    %c0_31 = arith.constant 0 : index
    %63 = vector.load %arg9[%c0_30, %c0_31] : memref<128x4xf32, #tpu.memory_space<vmem>>, vector<128x4xf32>
    %cst_32 = arith.constant dense<0.000000e+00> : vector<8x4xf32>
    %64 = tpu.matmul %62, %63, %cst_32 {dimension_numbers = #tpu.dot_dimension_numbers<[1], [0], [0], [1], [0, 0, 1, 1], [], []>} : vector<8x128xf32>, vector<128x4xf32>, vector<8x4xf32> -> vector<8x4xf32>
    %c0_33 = arith.constant 0 : index
    %c0_34 = arith.constant 0 : index
    %65 = vector.load %arg10[%c0_33, %c0_34] : memref<1x4xf32, #tpu.memory_space<vmem>>, vector<1x4xf32>
    %66 = vector.broadcast %65 : vector<1x4xf32> to vector<8x4xf32>
    %67 = arith.addf %64, %66 : vector<8x4xf32>
    %68 = math.tanh %67 : vector<8x4xf32>
    %c0_35 = arith.constant 0 : index
    %c0_36 = arith.constant 0 : index
    %69 = vector.load %arg11[%c0_35, %c0_36] : memref<8x4xf32, #tpu.memory_space<vmem>>, vector<8x4xf32>
    tpu.vector_store %arg11[%c0_35, %c0_36], %68 {strides = array<i32>} : memref<8x4xf32, #tpu.memory_space<vmem>>, vector<8x4xf32>,
    return
  }
}

</mosaic_0001>

<bundles_post_ra>
// kernel: tpu_custom_call.1
= control target key start
LH: loop header
LB: loop body
LE: loop exit
PB: predicated region body
PF: predicated region fallthrough
CT: control target
= control target key end

     0   :  { %16 = vsyncpa [#allocation3], 0  ;;  %s702_s17 = smov [#allocation2]   ;;  %s894_s0 = inlined_call_operand.vmem [shape: f32[8,32], index: 0, kind: input, shape index: {}]   ;;  %s895_s1 = inlined_call_operand.vmem [shape: f32[32,256], index: 1, kind: input, shape index: {}]   ;;  %s896_s2 = inlined_call_operand.vmem [shape: f32[1,256], index: 2, kind: input, shape index: {}]   ;;  %s897_s3 = inlined_call_operand.vmem [shape: f32[1,256], index: 3, kind: input, shape index: {}]   ;;  %s898_s4 = inlined_call_operand.vmem [shape: f32[1,256], index: 4, kind: input, shape index: {}]   ;;  %s899_s5 = inlined_call_operand.hbm [shape: f32[256,128], index: 5, kind: input, shape index: {}]   ;;  %s900_s6 = inlined_call_operand.vmem [shape: f32[1,128], index: 6, kind: input, shape index: {}]   ;;  %s901_s7 = inlined_call_operand.vmem [shape: f32[1,128], index: 7, kind: input, shape index: {}]   ;;  %s902_s8 = inlined_call_operand.vmem [shape: f32[1,128], index: 8, kind: input, shape index: {}]   ;;  %s903_s9 = inlined_call_operand.vmem [shape: f32[128,4], index: 9, kind: input, shape index: {}]   ;;  %s904_s10 = inlined_call_operand.vmem [shape: f32[1,4], index: 10, kind: input, shape index: {}]   ;;  %s905_s11 = inlined_call_operand.vmem [shape: f32[8,4], index: 11, kind: output, shape index: {}]  }
   0x1   :  { %s32_s18 = sshll.u32 %s702_s17, 4  ;;  %s678_s21 = scalar_lea.hbm %s899_s5, 4096  ;;  %s33_s18 = int_to_ptr.vmem [resolvable:$true] %s32_s18 }
   0x2   :  { %p679_p0 = scmp.ne.s32.totalorder %s899_s5, %s678_s21  ;;  %p682_p1 = scmp.lt.u32.totalorder %s678_s21, %s899_s5 }
   0x4   :  { %p684_p2 = pnand %p682_p1, %p679_p0 }
   0x6   :  { %687 = shalt.err (!%p684_p2)
}
   0x7   :  { %s688_s26 = scalar_lea.vmem %s33_s18, 4096  ;;  %p693_p4 = scmp.lt.s32.totalorder %s33_s18, %s33_s18 }
   0x8   :  { %p689_p3 = scmp.ne.s32.totalorder %s33_s18, %s688_s26  ;;  %p694_p5 = scmp.lt.s32.totalorder %s688_s26, %s688_s26 }
   0xa   :  { %p695_p6 = por %p694_p5, %p693_p4 }
   0xc   :  { %p696_p7 = pnand %p695_p6, %p689_p3 }
   0xe   :  { %699 = shalt.err (!%p696_p7)
}
   0xf   :  { %s703_s27 = smov 128   ;;  %s704_s28 = smov 8  }
  0x10   :  { %38 = dma.hbm_to_vmem [thread:$0]  %s899_s5, 4096, %s33_s18, [#allocation3], %s703_s27, %s703_s27, %s704_s28  }
  0x11   :  { %700 = dma.done.wait [#allocation3], 4096  }
  0x12   :  { %701 = vsyncadd [#allocation3], 4294963200  ;;  %v705_v0 = vmov 0.0   ;;  %v54_v1 = vld [vmem:[%s895_s1 + $0x8] sm:$0xff]  ;;  %v56_v2 = vld [vmem:[%s895_s1 + $0x18] sm:$0xff]  ;;  %vm73_vm0 = vcmask 261120   ;;  %v63_v62 = vlaneseq }
  0x13   :  { %141 = vmatprep.mubr.f32.mxu0 %v705_v0  ;;  %v53_v3 = vld [vmem:[%s895_s1] sm:$0xff]  ;;  %v599_v4 = vpack.c.bf16 %v56_v2, %v54_v1  ;;  %v55_v5 = vld [vmem:[%s895_s1 + $0x10] sm:$0xff]  ;;  %v58_v6 = vld [vmem:[%s895_s1 + $0x28] sm:$0xff]  ;;  %vm708_vm1 = vmmov 0   ;;  %vm502_vm2 = vcmask 31744  }
  0x14   :  { %v60_v7 = vld [vmem:[%s895_s1 + $0x38] sm:$0xff]  ;;  %v601_v8 = vpack.c.bf16 %v55_v5, %v53_v3  ;;  %v57_v10 = vld [vmem:[%s895_s1 + $0x20] sm:$0xff]  ;;  %v59_v11 = vld [vmem:[%s895_s1 + $0x30] sm:$0xff]  ;;  %v64_v63 = vshrl.u32 %v63_v62, 7 }
  0x15   :  { %v603_v9 = vpack.c.bf16 %v60_v7, %v58_v6  ;;  %600 = vmatprep.subr.bf16.mxu0 %v599_v4  ;;  %v605_v12 = vpack.c.bf16 %v59_v11, %v57_v10  ;;  %v52_v13 = vld [vmem:[%s894_s0] sm:$0xff]  ;;  %v276_v15 = vld [vmem:[#allocation2 + $0x88] sm:$0xff]  ;;  %v277_v19 = vld [vmem:[#allocation2 + $0x90] sm:$0xff] }
  0x16   :  { %602 = vmatpush1.bf16.msra.mxu0 %v601_v8  ;;  %v275_v14 = vld [vmem:[#allocation2 + $0x80] sm:$0xff]  ;;  %v260_v18 = vld [vmem:[#allocation2 + $0x8] sm:$0xff]  ;;  %v278_v20 = vld [vmem:[#allocation2 + $0x98] sm:$0xff]  ;;  %v809_v1 = vsub.s32 0, %v64_v63  ;;  %v814_v3 = vsub.s32 1, %v64_v63 }
  0x17   :  { %604 = vmatprep.subr.bf16.mxu0 %v603_v9  ;;  %v259_v16 = vld [vmem:[#allocation2] sm:$0xff]  ;;  %v607_v17 = vpack.c.bf16 %v276_v15, %v275_v14  ;;  %v611_v22 = vpack.c.bf16 %v278_v20, %v277_v19  ;;  %v261_v23 = vld [vmem:[#allocation2 + $0x10] sm:$0xff]  ;;  %v262_v24 = vld [vmem:[#allocation2 + $0x18] sm:$0xff] }
  0x18   :  { %v609_v21 = vpack.c.bf16 %v260_v18, %v259_v16  ;;  %v279_v25 = vld [vmem:[#allocation2 + $0xa0] sm:$0xff]  ;;  %v280_v26 = vld [vmem:[#allocation2 + $0xa8] sm:$0xff]  ;;  %v613_v27 = vpack.c.bf16 %v262_v24, %v261_v23  ;;  %v281_v31 = vld [vmem:[#allocation2 + $0xb0] sm:$0xff] }
  0x19   :  { %608 = vmatprep.subr.bf16.mxu1 %v607_v17  ;;  %v615_v28 = vpack.c.bf16 %v280_v26, %v279_v25  ;;  %v263_v29 = vld [vmem:[#allocation2 + $0x20] sm:$0xff]  ;;  %v264_v30 = vld [vmem:[#allocation2 + $0x28] sm:$0xff]  ;;  %v282_v32 = vld [vmem:[#allocation2 + $0xb8] sm:$0xff] }
  0x1a   :  { %606 = vmatpush1.bf16.msra.mxu0 %v605_v12  ;;  %610 = vmatpush3.bf16.msra.mxu1 %v609_v21  ;;  %v617_v33 = vpack.c.bf16 %v264_v30, %v263_v29  ;;  %v619_v34 = vpack.c.bf16 %v282_v32, %v281_v31  ;;  %v265_v35 = vld [vmem:[#allocation2 + $0x30] sm:$0xff]  ;;  %v266_v36 = vld [vmem:[#allocation2 + $0x38] sm:$0xff]  ;;  %v283_v37 = vld [vmem:[#allocation2 + $0xc0] sm:$0xff] }
  0x1b   :  { %612 = vmatprep.subr.bf16.mxu1 %v611_v22  ;;  %v284_v38 = vld [vmem:[#allocation2 + $0xc8] sm:$0xff]  ;;  %v621_v39 = vpack.c.bf16 %v266_v36, %v265_v35  ;;  %v267_v41 = vld [vmem:[#allocation2 + $0x40] sm:$0xff]  ;;  %v285_v43 = vld [vmem:[#allocation2 + $0xd0] sm:$0xff] }
  0x1c   :  { %v623_v40 = vpack.c.bf16 %v284_v38, %v283_v37  ;;  %v268_v42 = vld [vmem:[#allocation2 + $0x48] sm:$0xff]  ;;  %v286_v44 = vld [vmem:[#allocation2 + $0xd8] sm:$0xff]  ;;  %v269_v47 = vld [vmem:[#allocation2 + $0x50] sm:$0xff] }
  0x1d   :  { %509 = vmatmul.mubr.msk.f32.vlgmr.msra.gmra.mrb[0].mxu0 %vm73_vm0, %v52_v13  ;;  %v625_v45 = vpack.c.bf16 %v268_v42, %v267_v41  ;;  %v627_v46 = vpack.c.bf16 %v286_v44, %v285_v43  ;;  %v270_v48 = vld [vmem:[#allocation2 + $0x58] sm:$0xff]  ;;  %v287_v49 = vld [vmem:[#allocation2 + $0xe0] sm:$0xff]  ;;  %v288_v50 = vld [vmem:[#allocation2 + $0xe8] sm:$0xff] }
  0x1e   :  { %614 = vmatpush3.bf16.msra.mxu1 %v613_v27  ;;  %v629_v51 = vpack.c.bf16 %v270_v48, %v269_v47  ;;  %v631_v52 = vpack.c.bf16 %v288_v50, %v287_v49  ;;  %v271_v53 = vld [vmem:[#allocation2 + $0x60] sm:$0xff]  ;;  %v272_v54 = vld [vmem:[#allocation2 + $0x68] sm:$0xff]  ;;  %v289_v55 = vld [vmem:[#allocation2 + $0xf0] sm:$0xff]  ;;  %596 = vmatprep.mubr.msk.f32.mxu0 %vm708_vm1, %v705_v0 }
  0x1f   :  { %616 = vmatprep.subr.bf16.mxu1 %v615_v28  ;;  %v290_v56 = vld [vmem:[#allocation2 + $0xf8] sm:$0xff]  ;;  %v633_v57 = vpack.c.bf16 %v272_v54, %v271_v53  ;;  %v273_v59 = vld [vmem:[#allocation2 + $0x70] sm:$0xff]  ;;  %v61_v2 = vld [vmem:[%s896_s2] sm:$0x3] }
  0x20   :  { %v635_v58 = vpack.c.bf16 %v290_v56, %v289_v55  ;;  %v274_v60 = vld [vmem:[#allocation2 + $0x78] sm:$0xff]  ;;  %v66_v4 = vrot.slane %v61_v2, %v809_v1  ;;  %v70_v5 = vrot.slane %v61_v2, %v814_v3  ;;  %v148_v54 = vld [vmem:[%s897_s3] sm:$0x3] }
  0x21   :  { %v637_v61 = vpack.c.bf16 %v274_v60, %v273_v59 }
  0x22   :  { %618 = vmatpush3.bf16.msra.mxu1 %v617_v33 }
  0x23   :  { %620 = vmatprep.subr.bf16.mxu1 %v619_v34 }
  0x26   :  { %622 = vmatpush3.bf16.msra.mxu1 %v621_v39 }
  0x27   :  { %624 = vmatprep.subr.bf16.mxu1 %v623_v40 }
  0x2a   :  { %626 = vmatpush3.bf16.msra.mxu1 %v625_v45 }
  0x2b   :  { %628 = vmatprep.subr.bf16.mxu1 %v627_v46  ;;  %v706_v46 = vmov 1966171168  }
  0x2c   :  { %v193_v47 = vunpack.c.l.s4 %v706_v46 }
  0x2e   :  { %630 = vmatpush3.bf16.msra.mxu1 %v629_v51  ;;  %v194_v48 = vunpack.c.0.s8 %v193_v47 }
  0x2f   :  { %632 = vmatprep.subr.bf16.mxu1 %v631_v52 }
  0x30   :  { %v197_v50 = vsub.s32 %v194_v48, %v64_v63  ;;  %v149_v63 = vld [vmem:[%s898_s4] sm:$0x3] }
  0x32   :  { %634 = vmatpush3.bf16.msra.mxu1 %v633_v57 }
  0x33   :  { %636 = vmatprep.subr.bf16.mxu1 %v635_v58 }
  0x36   :  { %638 = vmatpush3.bf16.msra.mxu1 %v637_v61 }
  0xf0   :  { %v143_v6 = vpop.f32.mrb[0].mxu0 }
  0xf1   :  { %v144_v7 = vadd.f32 %v143_v6, %v66_v4  ;;  %v145_v8 = vpop.f32.mrb[1].mxu0 }
  0xf2   :  { %v146_v9 = vadd.f32 %v145_v8, %v70_v5 }
  0xf3   :  { %v150_v10 = vrot.slane %v144_v7, 4  ;;  %v165_v11 = vmul.f32 %v144_v7, %v144_v7 }
  0xf4   :  { %v156_v12 = vrot.slane %v146_v9, 4  ;;  %v166_v13 = vmul.f32 %v146_v9, %v146_v9 }
  0xf5   :  { %v151_v14 = vadd.f32 %v150_v10, %v144_v7  ;;  %v167_v15 = vrot.slane %v165_v11, 4 }
  0xf6   :  { %v157_v16 = vadd.f32 %v156_v12, %v146_v9  ;;  %v173_v17 = vrot.slane %v166_v13, 4 }
  0xf7   :  { %v152_v18 = vrot.slane %v151_v14, 2  ;;  %v168_v19 = vadd.f32 %v167_v15, %v165_v11 }
  0xf8   :  { %v158_v20 = vrot.slane %v157_v16, 2  ;;  %v174_v21 = vadd.f32 %v173_v17, %v166_v13 }
  0xf9   :  { %v153_v22 = vadd.f32 %v152_v18, %v151_v14  ;;  %v169_v23 = vrot.slane %v168_v19, 2  ;;  %v410_v18 = vld [vmem:[%s903_s9 + $0x10] sm:$0xff] }
  0xfa   :  { %v159_v24 = vadd.f32 %v158_v20, %v157_v16  ;;  %v175_v25 = vrot.slane %v174_v21, 2 }
  0xfb   :  { %v154_v26 = vrot.slane %v153_v22, 1  ;;  %v170_v27 = vadd.f32 %v169_v23, %v168_v19  ;;  %v411_v19 = vld [vmem:[%s903_s9 + $0x18] sm:$0xff] }
  0xfc   :  { %v176_v28 = vadd.f32 %v175_v25, %v174_v21  ;;  %v160_v29 = vrot.slane %v159_v24, 1  ;;  %v643_v20 = vpack.c.bf16 %v411_v19, %v410_v18  ;;  %v412_v21 = vld [vmem:[%s903_s9 + $0x20] sm:$0xff]  ;;  %v415_v25 = vld [vmem:[%s903_s9 + $0x38] sm:$0xff] }
  0xfd   :  { %v155_v30 = vadd.f32 %v154_v26, %v153_v22  ;;  %v171_v31 = vrot.slane %v170_v27, 1  ;;  %v413_v22 = vld [vmem:[%s903_s9 + $0x28] sm:$0xff] }
  0xfe   :  { %v177_v32 = vrot.slane %v176_v28, 1  ;;  %v161_v33 = vadd.f32 %v160_v29, %v159_v24  ;;  %v646_v23 = vpack.c.bf16 %v413_v22, %v412_v21  ;;  %v414_v24 = vld [vmem:[%s903_s9 + $0x30] sm:$0xff] }
  0xff   :  { %v163_v34 = vmul.f32 0.125, %v155_v30  ;;  %v172_v35 = vadd.f32 %v171_v31, %v170_v27  ;;  %v649_v26 = vpack.c.bf16 %v415_v25, %v414_v24  ;;  %v416_v27 = vld [vmem:[%s903_s9 + $0x40] sm:$0xff]  ;;  %v418_v30 = vld [vmem:[%s903_s9 + $0x50] sm:$0xff]  ;;  %v419_v31 = vld [vmem:[%s903_s9 + $0x58] sm:$0xff] }
 0x100   :  { %v178_v36 = vadd.f32 %v177_v32, %v176_v28  ;;  %v164_v37 = vmul.f32 0.125, %v161_v33  ;;  %v417_v28 = vld [vmem:[%s903_s9 + $0x48] sm:$0xff]  ;;  %v655_v32 = vpack.c.bf16 %v419_v31, %v418_v30  ;;  %v420_v33 = vld [vmem:[%s903_s9 + $0x60] sm:$0xff] }
 0x101   :  { %v179_v38 = vmul.f32 0.125, %v172_v35  ;;  %v181_v39 = vmul.f32 %v163_v34, %v163_v34  ;;  %v652_v29 = vpack.c.bf16 %v417_v28, %v416_v27  ;;  %v422_v35 = vld [vmem:[%s903_s9 + $0x70] sm:$0xff] }
 0x102   :  { %v180_v40 = vmul.f32 0.125, %v178_v36  ;;  %v182_v41 = vmul.f32 %v164_v37, %v164_v37 }
 0x103   :  { %v183_v42 = vsub.f32 %v179_v38, %v181_v39 }
 0x104   :  { %v184_v43 = vsub.f32 %v180_v40, %v182_v41  ;;  %v510_v40 = vld [vmem:[%s900_s6] ss:$0 sm:$0xff] }
 0x105   :  { %v185_v44 = vadd.f32 1e-05, %v183_v42 }
 0x106   :  { %v186_v45 = vadd.f32 1e-05, %v184_v43 }
 0x107   :  { %670 = vrsqrt.f32 %v185_v44 }
 0x108   :  { %672 = vrsqrt.f32 %v186_v45 }
 0x111   :  { %v671_v49 = vpop.eup %670 }
 0x112   :  { %v673_v51 = vpop.eup %672 }
 0x113   :  { %v191_v52 = vcombine.low %v671_v49, %v673_v51 }
 0x115   :  { %v198_v53 = vrot.slane %v191_v52, %v197_v50 }
 0x117   :  { %v205_v55 = vrot.slane %v198_v53, %v197_v50 }
 0x119   :  { %v207_v56 = vmul.f32 %v205_v55, %v148_v54 }
 0x11b   :  { %v212_v57 = vrot.slane %v207_v56, %v809_v1  ;;  %v216_v58 = vrot.slane %v207_v56, %v814_v3 }
 0x11d   :  { %v219_v59 = vmul.f32 %v212_v57, %v163_v34  ;;  %v220_v60 = vmul.f32 %v216_v58, %v164_v37  ;;  %v241_v61 = vmul.f32 %v216_v58, %v146_v9  ;;  %v240_v62 = vmul.f32 %v212_v57, %v144_v7  ;;  %v408_v7 = vld [vmem:[%s903_s9] sm:$0xff]  ;;  %v409_v9 = vld [vmem:[%s903_s9 + $0x8] sm:$0xff]  ;;  %v423_v37 = vld [vmem:[%s903_s9 + $0x78] sm:$0xff] }
 0x11e   :  { %v640_v17 = vpack.c.bf16 %v409_v9, %v408_v7  ;;  %v421_v34 = vld [vmem:[%s903_s9 + $0x68] sm:$0xff]  ;;  %v661_v38 = vpack.c.bf16 %v423_v37, %v422_v35 }
 0x11f   :  { %v223_v2 = vcombine.low %v219_v59, %v220_v60  ;;  %v658_v36 = vpack.c.bf16 %v421_v34, %v420_v33 }
 0x121   :  { %v230_v4 = vrot.slane %v223_v2, %v197_v50 }
 0x123   :  { %v237_v5 = vrot.slane %v230_v4, %v197_v50  ;;  %v369_v4 = vld [vmem:[%s902_s8] sm:$0x1] }
 0x125   :  { %v239_v6 = vsub.f32 %v149_v63, %v237_v5 }
 0x127   :  { %v250_v8 = vrot.slane %v239_v6, %v814_v3  ;;  %v246_v10 = vrot.slane %v239_v6, %v809_v1  ;;  %v707_v3 = vmov 0.0|0.0  }
 0x128   :  { %639 = vmatprep.subr.bf16.mxu0 %v707_v3 }
 0x129   :  { %v254_v11 = vadd.f32 %v250_v8, %v241_v61  ;;  %v253_v12 = vadd.f32 %v246_v10, %v240_v62  ;;  %641 = vmatpush3.bf16.msra.mxu0 %v640_v17  ;;  %v368_v61 = vld [vmem:[%s901_s7] sm:$0x1] }
 0x12a   :  { %642 = vmatprep.subr.bf16.mxu0 %v707_v3 }
 0x12b   :  { %v256_v13 = vmul.f32 0.01, %v254_v11  ;;  %v255_v14 = vmul.f32 0.01, %v253_v12 }
 0x12d   :  { %v258_v15 = vmax.f32 %v254_v11, %v256_v13  ;;  %v257_v16 = vmax.f32 %v253_v12, %v255_v14  ;;  %644 = vmatpush3.bf16.msra.mxu0 %v643_v20  ;;  %v511_v14 = vld [vmem:[%s904_s10] ss:$0 sm:$0xff] }
 0x12e   :  { %645 = vmatprep.subr.bf16.mxu0 %v707_v3 }
 0x12f   :  { %362 = vmatprep.mubr.f32.mxu1 %v258_v15 }
 0x130   :  { %363 = vmatmul.mubr.f32.vlgmr.msra.gmra.mrb[0].mxu1 %v257_v16 }
 0x131   :  { %647 = vmatpush3.bf16.msra.mxu0 %v646_v23 }
 0x132   :  { %648 = vmatprep.subr.bf16.mxu0 %v707_v3 }
 0x135   :  { %650 = vmatpush3.bf16.msra.mxu0 %v649_v26 }
 0x136   :  { %651 = vmatprep.subr.bf16.mxu0 %v707_v3 }
 0x139   :  { %653 = vmatpush3.bf16.msra.mxu0 %v652_v29 }
 0x13a   :  { %654 = vmatprep.subr.bf16.mxu0 %v707_v3 }
 0x13d   :  { %656 = vmatpush3.bf16.msra.mxu0 %v655_v32 }
 0x13e   :  { %657 = vmatprep.subr.bf16.mxu0 %v707_v3 }
 0x141   :  { %659 = vmatpush3.bf16.msra.mxu0 %v658_v36 }
 0x142   :  { %660 = vmatprep.subr.bf16.mxu0 %v707_v3 }
 0x145   :  { %662 = vmatpush3.bf16.msra.mxu0 %v661_v38 }
 0x203   :  { %v544_v39 = vpop.f32.mrb[0].mxu1 }
 0x204   :  { %v545_v41 = vpop.f32.mrb[1].mxu1 }
 0x205   :  { %v546_v42 = vadd.f32 %v545_v41, %v544_v39 }
 0x207   :  { %v365_v43 = vadd.f32 %v546_v42, %v510_v40 }
 0x209   :  { %v370_v44 = vrot.slane %v365_v43, 4  ;;  %v377_v45 = vmul.f32 %v365_v43, %v365_v43 }
 0x20b   :  { %v371_v46 = vadd.f32 %v370_v44, %v365_v43  ;;  %v378_v47 = vrot.slane %v377_v45, 4 }
 0x20d   :  { %v372_v48 = vrot.slane %v371_v46, 2  ;;  %v379_v49 = vadd.f32 %v378_v47, %v377_v45 }
 0x20f   :  { %v373_v50 = vadd.f32 %v372_v48, %v371_v46  ;;  %v380_v0 = vrot.slane %v379_v49, 2 }
 0x211   :  { %v374_v51 = vrot.slane %v373_v50, 1  ;;  %v381_v52 = vadd.f32 %v380_v0, %v379_v49 }
 0x213   :  { %v375_v53 = vadd.f32 %v374_v51, %v373_v50  ;;  %v382_v54 = vrot.slane %v381_v52, 1 }
 0x215   :  { %v376_v55 = vmul.f32 0.125, %v375_v53  ;;  %v383_v56 = vadd.f32 %v382_v54, %v381_v52 }
 0x217   :  { %v384_v57 = vmul.f32 0.125, %v383_v56  ;;  %v385_v58 = vmul.f32 %v376_v55, %v376_v55 }
 0x219   :  { %v386_v59 = vsub.f32 %v384_v57, %v385_v58 }
 0x21b   :  { %v387_v60 = vadd.f32 1e-05, %v386_v59 }
 0x21d   :  { %674 = vrsqrt.f32 %v387_v60 }
 0x227   :  { %v675_v62 = vpop.eup %674 }
 0x228   :  { %v389_v2 = vmul.f32 %v675_v62, %v368_v61 }
 0x22a   :  { %v396_v63 = vrot.slane %v389_v2, %v809_v1  ;;  %v390_v5 = vmul.f32 %v389_v2, %v376_v55 }
 0x22c   :  { %v391_v6 = vsub.f32 %v369_v4, %v390_v5  ;;  %v398_v8 = vmul.f32 %v396_v63, %v365_v43 }
 0x22e   :  { %v403_v10 = vrot.slane %v391_v6, %v809_v1 }
 0x230   :  { %v405_v11 = vadd.f32 %v403_v10, %v398_v8 }
 0x232   :  { %v406_v12 = vmul.f32 0.01, %v405_v11 }
 0x234   :  { %v407_v13 = vmax.f32 %v405_v11, %v406_v12 }
 0x236   :  { %597 = vmatmul.mubr.f32.vlgmr.msra.gmra.mrb[2].mxu0 %v407_v13 }
 0x309   :  { %v497_v15 = vpop.f32.mrb[2].mxu0 }
 0x30a   :  { %v498_v16 = vadd.f32 %v511_v14, %v497_v15  ;;  %v598_v7 = vpop.f32.mrb[3].mxu0 }
 0x30c   :  { %676 = vtanh.f32 %v498_v16 }
 0x316   :  { %v677_v9 = vpop.eup %676 }
 0x317   :  { %503 = vst.msk [vmem:[%s905_s11] sm:$0xff] %vm502_vm2, %v677_v9 }
 0x318   :  { %508 = vsyncpa [#allocation3], 1 }

</bundles_post_ra>
